<compile_context>
chip_gen: v7x
topology: tpu7x:2x2x1
jax: 0.10.0
libtpu: 0.0.40
codegen_flags: <defaults>
</compile_context>

<pallas_src>
import functools

import jax
import jax.numpy as jnp
from jax.experimental import pallas as pl
from jax.experimental.pallas import tpu as pltpu

_LANE = 128      # vreg lane width
_SUBLANE = 8     # f32 sublane count


def _round_up(n, m):
    return ((n + m - 1) // m) * m


def _pad2(a, rows, cols):
    r, c = a.shape
    return jnp.pad(a, ((0, rows - r), (0, cols - c)))


def qnetwork_kernel(x_ref, w1_ref, w2_ref, w3_ref, b_ref, o_ref):
    n = w2_ref.shape[0]          # padded hidden width N
    a = w3_ref.shape[1]          # padded action width A
    b_all = b_ref[...]           # (3, NA) stacked biases, resident in VMEM
    # fc1 + relu
    h1 = jnp.dot(x_ref[...], w1_ref[...], preferred_element_type=jnp.float32)
    h1 = jnp.maximum(h1 + b_all[0:1, :n], 0.0)
    # fc2 + relu
    h2 = jnp.dot(h1, w2_ref[...], preferred_element_type=jnp.float32)
    h2 = jnp.maximum(h2 + b_all[1:2, :n], 0.0)
    # fc3 (no activation)
    out = jnp.dot(h2, w3_ref[...], preferred_element_type=jnp.float32)
    o_ref[...] = (out + b_all[2:3, :a]).astype(o_ref.dtype)


def prepare_params(params):
    """Pad weights to lane-dense 128 multiples and stack biases. Call ONCE, reuse
    the returned dict for every forward call (removes ~6 pad ops per invocation)."""
    w1, b1 = params["w1"], params["b1"]
    w2, b2 = params["w2"], params["b2"]
    w3, b3 = params["w3"], params["b3"]
    state_size, nodes = w1.shape
    action_size = w3.shape[1]

    K = _round_up(state_size, _LANE)
    N = _round_up(nodes, _LANE)
    A = _round_up(action_size, _LANE)
    NA = max(N, A)

    b_stack = jnp.concatenate(
        [_pad2(b1.reshape(1, -1), 1, NA),
         _pad2(b2.reshape(1, -1), 1, NA),
         _pad2(b3.reshape(1, -1), 1, NA)],
        axis=0)                                   # (3, NA)

    return {
        "w1": _pad2(w1, K, N),                    # (K, N)
        "w2": _pad2(w2, N, N),                    # (N, N)
        "w3": _pad2(w3, N, A),                    # (N, A)
        "b": b_stack,                             # (3, NA)
    }


def _choose_batch_tiling(B, block_b):
    """Pick (tile_rows, padded_batch, steps). For multi-step grids force an even
    step count so v7x's two TensorCores split the 'parallel' axis evenly."""
    steps = -(-B // block_b)
    if steps > 1 and steps % 2:
        steps += 1
    tb = _round_up(-(-B // steps), _SUBLANE)
    Bp = steps * tb
    return tb, Bp, steps


@functools.partial(jax.jit, static_argnames=("action_size", "block_b"))
def qnetwork_forward(x, padded_params, *, action_size, block_b=512):
    """x: (B, state_size) f32; padded_params: output of prepare_params."""
    w1p = padded_params["w1"]
    w2p = padded_params["w2"]
    w3p = padded_params["w3"]
    bp = padded_params["b"]

    B = x.shape[0]
    K = w1p.shape[0]
    N = w2p.shape[0]
    A = w3p.shape[1]
    NA = bp.shape[1]

    tb, Bp, steps = _choose_batch_tiling(B, block_b)
    x_p = _pad2(x, Bp, K)

    resident = lambda i: (0, 0)   # weights/biases DMA'd once, stay VMEM-resident
    out_p = pl.pallas_call(
        qnetwork_kernel,
        out_shape=jax.ShapeDtypeStruct((Bp, A), jnp.float32),
        grid=(steps,),
        in_specs=[
            pl.BlockSpec((tb, K), lambda i: (i, 0)),   # x: tiled over batch
            pl.BlockSpec((K, N), resident),            # w1
            pl.BlockSpec((N, N), resident),            # w2
            pl.BlockSpec((N, A), resident),            # w3
            pl.BlockSpec((3, NA), resident),           # stacked biases
        ],
        out_specs=pl.BlockSpec((tb, A), lambda i: (i, 0)),
        compiler_params=pltpu.CompilerParams(
            dimension_semantics=("parallel",),
        ),
    )(x_p, w1p, w2p, w3p, bp)

    # Padded rows pick up ReLU(bias) garbage; only this slice is valid.
    return out_p[:B, :action_size]


def init_params(key, state_size, action_size, nodes):
    """nn.Linear-like fan-in uniform init, stored (in, out)."""
    k1, k2, k3, k4, k5, k6 = jax.random.split(key, 6)
    s1 = 1.0 / jnp.sqrt(state_size)
    s2 = 1.0 / jnp.sqrt(nodes)
    return {
        "w1": jax.random.uniform(k1, (state_size, nodes), jnp.float32, -s1, s1),
        "b1": jax.random.uniform(k2, (1, nodes), jnp.float32, -s1, s1),
        "w2": jax.random.uniform(k3, (nodes, nodes), jnp.float32, -s2, s2),
        "b2": jax.random.uniform(k4, (1, nodes), jnp.float32, -s2, s2),
        "w3": jax.random.uniform(k5, (nodes, action_size), jnp.float32, -s2, s2),
        "b3": jax.random.uniform(k6, (1, action_size), jnp.float32, -s2, s2),
    }


if __name__ == "__main__":
    # Small shapes consistent with the module: state_size=8, nodes=32, action_size=4, batch=8.
    state_size, action_size, nodes, batch = 8, 4, 32, 8

    key = jax.random.PRNGKey(0)
    k_x, k_p = jax.random.split(key)
    x = jax.random.normal(k_x, (batch, state_size), dtype=jnp.float32)
    params = init_params(k_p, state_size, action_size, nodes)
    padded = prepare_params(params)          # pad weights ONCE, reuse per call

    out = qnetwork_forward(x, padded, action_size=action_size)
    jax.block_until_ready(out)

    # Reference in plain JAX (same math).
    def ref(x, p):
        h1 = jnp.maximum(x @ p["w1"] + p["b1"], 0.0)
        h2 = jnp.maximum(h1 @ p["w2"] + p["b2"], 0.0)
        return h2 @ p["w3"] + p["b3"]

    expected = ref(x, params)
    assert out.shape == (batch, action_size)
    assert jnp.allclose(out, expected, atol=1e-5, rtol=1e-5)

    # Exercise the multi-step (even, balanced) grid path for correctness.
    big_b = 600  # -> 2 grid steps of 304 rows with block_b=512
    xb = jax.random.normal(jax.random.PRNGKey(1), (big_b, state_size), dtype=jnp.float32)
    out_big = qnetwork_forward(xb, padded, action_size=action_size)
    jax.block_until_ready(out_big)
    assert out_big.shape == (big_b, action_size)
    assert jnp.allclose(out_big, ref(xb, params), atol=1e-5, rtol=1e-5)

    print("KERNEL_OK")
</pallas_src>

<mosaic_0001>
module attributes {stable_mosaic.version = 11 : i64} {
  func.func @qnetwork_kernel(%arg0: i32, %arg1: memref<8x128xf32, #tpu.memory_space<vmem>>, %arg2: memref<128x128xf32, #tpu.memory_space<vmem>>, %arg3: memref<128x128xf32, #tpu.memory_space<vmem>>, %arg4: memref<128x128xf32, #tpu.memory_space<vmem>>, %arg5: memref<3x128xf32, #tpu.memory_space<vmem>>, %arg6: memref<8x128xf32, #tpu.memory_space<vmem>>) attributes {dimension_semantics = [#tpu.dimension_semantics<parallel>], iteration_bounds = array<i64: 1>, scalar_prefetch = 0 : i64, scratch_operands = 0 : i64, tpu.core_type = #tpu.core_type<tc>, window_params = [{transform_indices = @transform_0, window_bounds = array<i64: 8, 128>}, {pipeline_mode = #tpu.pipeline_mode<synchronous>, transform_indices = @transform_1, window_bounds = array<i64: 128, 128>}, {pipeline_mode = #tpu.pipeline_mode<synchronous>, transform_indices = @transform_2, window_bounds = array<i64: 128, 128>}, {pipeline_mode = #tpu.pipeline_mode<synchronous>, transform_indices = @transform_3, window_bounds = array<i64: 128, 128>}, {pipeline_mode = #tpu.pipeline_mode<synchronous>, transform_indices = @transform_4, window_bounds = array<i64: 3, 128>}, {transform_indices = @transform_5, window_bounds = array<i64: 8, 128>}]} {
    %c0 = arith.constant 0 : index
    %c0_0 = arith.constant 0 : index
    %0 = vector.load %arg5[%c0, %c0_0] : memref<3x128xf32, #tpu.memory_space<vmem>>, vector<3x128xf32>
    %c0_1 = arith.constant 0 : index
    %c0_2 = arith.constant 0 : index
    %1 = vector.load %arg1[%c0_1, %c0_2] : memref<8x128xf32, #tpu.memory_space<vmem>>, vector<8x128xf32>
    %c0_3 = arith.constant 0 : index
    %c0_4 = arith.constant 0 : index
    %2 = vector.load %arg2[%c0_3, %c0_4] : memref<128x128xf32, #tpu.memory_space<vmem>>, vector<128x128xf32>
    %cst = arith.constant dense<0.000000e+00> : vector<8x128xf32>
    %3 = tpu.matmul %1, %2, %cst {dimension_numbers = #tpu.dot_dimension_numbers<[1], [0], [0], [1], [0, 0, 1, 1], [], []>} : vector<8x128xf32>, vector<128x128xf32>, vector<8x128xf32> -> vector<8x128xf32>
    %4 = vector.extract_strided_slice %0 {offsets = [0, 0], sizes = [1, 128], strides = [1, 1]} : vector<3x128xf32> to vector<1x128xf32>
    %5 = vector.broadcast %4 : vector<1x128xf32> to vector<8x128xf32>
    %6 = arith.addf %3, %5 : vector<8x128xf32>
    %cst_5 = arith.constant 0.000000e+00 : f32
    %7 = vector.broadcast %cst_5 : f32 to vector<8x128xf32>
    %8 = arith.maximumf %6, %7 : vector<8x128xf32>
    %c0_6 = arith.constant 0 : index
    %c0_7 = arith.constant 0 : index
    %9 = vector.load %arg3[%c0_6, %c0_7] : memref<128x128xf32, #tpu.memory_space<vmem>>, vector<128x128xf32>
    %cst_8 = arith.constant dense<0.000000e+00> : vector<8x128xf32>
    %10 = tpu.matmul %8, %9, %cst_8 {dimension_numbers = #tpu.dot_dimension_numbers<[1], [0], [0], [1], [0, 0, 1, 1], [], []>} : vector<8x128xf32>, vector<128x128xf32>, vector<8x128xf32> -> vector<8x128xf32>
    %11 = vector.extract_strided_slice %0 {offsets = [1, 0], sizes = [1, 128], strides = [1, 1]} : vector<3x128xf32> to vector<1x128xf32>
    %12 = vector.broadcast %11 : vector<1x128xf32> to vector<8x128xf32>
    %13 = arith.addf %10, %12 : vector<8x128xf32>
    %cst_9 = arith.constant 0.000000e+00 : f32
    %14 = vector.broadcast %cst_9 : f32 to vector<8x128xf32>
    %15 = arith.maximumf %13, %14 : vector<8x128xf32>
    %c0_10 = arith.constant 0 : index
    %c0_11 = arith.constant 0 : index
    %16 = vector.load %arg4[%c0_10, %c0_11] : memref<128x128xf32, #tpu.memory_space<vmem>>, vector<128x128xf32>
    %cst_12 = arith.constant dense<0.000000e+00> : vector<8x128xf32>
    %17 = tpu.matmul %15, %16, %cst_12 {dimension_numbers = #tpu.dot_dimension_numbers<[1], [0], [0], [1], [0, 0, 1, 1], [], []>} : vector<8x128xf32>, vector<128x128xf32>, vector<8x128xf32> -> vector<8x128xf32>
    %18 = vector.extract_strided_slice %0 {offsets = [2, 0], sizes = [1, 128], strides = [1, 1]} : vector<3x128xf32> to vector<1x128xf32>
    %19 = vector.broadcast %18 : vector<1x128xf32> to vector<8x128xf32>
    %20 = arith.addf %17, %19 : vector<8x128xf32>
    %c0_13 = arith.constant 0 : index
    %c0_14 = arith.constant 0 : index
    %21 = vector.load %arg6[%c0_13, %c0_14] : memref<8x128xf32, #tpu.memory_space<vmem>>, vector<8x128xf32>
    tpu.vector_store %arg6[%c0_13, %c0_14], %20 {strides = array<i32>} : memref<8x128xf32, #tpu.memory_space<vmem>>, vector<8x128xf32>,
    return
  }
  func.func @transform_0(%arg0: i32) -> (i32, i32) {
    %c0_i32 = arith.constant 0 : i32
    %c0_i32_0 = arith.constant 0 : i32
    return %arg0, %c0_i32 : i32, i32
  }
  func.func @transform_1(%arg0: i32) -> (i32, i32) {
    %c0_i32 = arith.constant 0 : i32
    %c0_i32_0 = arith.constant 0 : i32
    %c0_i32_1 = arith.constant 0 : i32
    return %c0_i32, %c0_i32_0 : i32, i32
  }
  func.func @transform_2(%arg0: i32) -> (i32, i32) {
    %c0_i32 = arith.constant 0 : i32
    %c0_i32_0 = arith.constant 0 : i32
    %c0_i32_1 = arith.constant 0 : i32
    return %c0_i32, %c0_i32_0 : i32, i32
  }
  func.func @transform_3(%arg0: i32) -> (i32, i32) {
    %c0_i32 = arith.constant 0 : i32
    %c0_i32_0 = arith.constant 0 : i32
    %c0_i32_1 = arith.constant 0 : i32
    return %c0_i32, %c0_i32_0 : i32, i32
  }
  func.func @transform_4(%arg0: i32) -> (i32, i32) {
    %c0_i32 = arith.constant 0 : i32
    %c0_i32_0 = arith.constant 0 : i32
    %c0_i32_1 = arith.constant 0 : i32
    return %c0_i32, %c0_i32_0 : i32, i32
  }
  func.func @transform_5(%arg0: i32) -> (i32, i32) {
    %c0_i32 = arith.constant 0 : i32
    %c0_i32_0 = arith.constant 0 : i32
    return %arg0, %c0_i32 : i32, i32
  }
}

</mosaic_0001>

<bundles_post_ra>
// kernel: qnetwork_forward.1
= control target key start
LH: loop header
LB: loop body
LE: loop exit
PB: predicated region body
PF: predicated region fallthrough
CT: control target
= control target key end

     0   :  { %10 = vsyncpa [#allocation3], 0  ;;  %s777_s0 = inlined_call_operand.vmem [shape: f32[8,128], index: 0, kind: input, shape index: {}]   ;;  %s778_s1 = inlined_call_operand.hbm [shape: f32[128,128], index: 1, kind: input, shape index: {}]   ;;  %s779_s2 = inlined_call_operand.hbm [shape: f32[128,128], index: 2, kind: input, shape index: {}]   ;;  %s780_s3 = inlined_call_operand.hbm [shape: f32[128,128], index: 3, kind: input, shape index: {}]   ;;  %s781_s4 = inlined_call_operand.vmem [shape: f32[3,128], index: 4, kind: input, shape index: {}]   ;;  %s782_s5 = inlined_call_operand.vmem [shape: f32[8,128], index: 5, kind: output, shape index: {}]  }
   0x1   :  { %11 = vsyncpa [#allocation5], 0  ;;  %s648_s18 = smov [#allocation4]   ;;  %s649_s20 = smov [#allocation2]  }
   0x2   :  { %s31_s19 = sshll.u32 %s648_s18, 4  ;;  %s19_s21 = sshll.u32 %s649_s20, 4  ;;  %s32_s19 = int_to_ptr.vmem [resolvable:$true] %s31_s19  ;;  %s686_s21 = int_to_ptr.vmem [resolvable:$true] %s19_s21 }
   0x3   :  { %s578_s24 = scalar_lea.hbm %s779_s2, 2048 }
   0x4   :  { %p579_p0 = scmp.ne.s32.totalorder %s779_s2, %s578_s24  ;;  %p582_p1 = scmp.lt.u32.totalorder %s578_s24, %s779_s2 }
   0x6   :  { %p584_p2 = pnand %p582_p1, %p579_p0 }
   0x8   :  { %587 = shalt.err (!%p584_p2)
}
   0x9   :  { %s588_s29 = scalar_lea.vmem %s32_s19, 2048  ;;  %p593_p4 = scmp.lt.s32.totalorder %s32_s19, %s32_s19 }
   0xa   :  { %p589_p3 = scmp.ne.s32.totalorder %s32_s19, %s588_s29  ;;  %p594_p5 = scmp.lt.s32.totalorder %s588_s29, %s588_s29 }
   0xc   :  { %p595_p6 = por %p594_p5, %p593_p4 }
   0xe   :  { %p596_p7 = pnand %p595_p6, %p589_p3 }
  0x10   :  { %599 = shalt.err (!%p596_p7)
}
  0x11   :  { %s650_s30 = smov 128   ;;  %s651_s6 = smov 8  }
  0x12   :  { %37 = dma.hbm_to_vmem [thread:$0]  %s779_s2, 2048, %s32_s19, [#allocation5], %s650_s30, %s650_s30, %s651_s6  }
  0x13   :  { %s600_s11 = scalar_lea.hbm %s778_s1, 2048 }
  0x14   :  { %p601_p8 = scmp.ne.s32.totalorder %s778_s1, %s600_s11  ;;  %p604_p9 = scmp.lt.u32.totalorder %s600_s11, %s778_s1 }
  0x16   :  { %p606_p10 = pnand %p604_p9, %p601_p8 }
  0x18   :  { %609 = shalt.err (!%p606_p10)
}
  0x19   :  { %s610_s16 = scalar_lea.vmem %s686_s21, 2048  ;;  %p615_p12 = scmp.lt.s32.totalorder %s686_s21, %s686_s21 }
  0x1a   :  { %p611_p11 = scmp.ne.s32.totalorder %s686_s21, %s610_s16  ;;  %p616_p13 = scmp.lt.s32.totalorder %s610_s16, %s610_s16 }
  0x1c   :  { %p617_p0 = por %p616_p13, %p615_p12 }
  0x1e   :  { %p618_p1 = pnand %p617_p0, %p611_p11 }
  0x20   :  { %621 = shalt.err (!%p618_p1)
}
  0x21   :  { %25 = dma.hbm_to_vmem [thread:$0]  %s778_s1, 2048, %s686_s21, [#allocation3], %s650_s30, %s650_s30, %s651_s6  }
  0x22   :  { %s652_s18 = smov [#allocation6]   ;;  %s622_s23 = scalar_lea.hbm %s780_s3, 2048 }
  0x23   :  { %s43_s19 = sshll.u32 %s652_s18, 4  ;;  %p623_p2 = scmp.ne.s32.totalorder %s780_s3, %s622_s23  ;;  %s44_s19 = int_to_ptr.vmem [resolvable:$true] %s43_s19 }
  0x24   :  { %p626_p3 = scmp.lt.u32.totalorder %s622_s23, %s780_s3 }
  0x26   :  { %p628_p4 = pnand %p626_p3, %p623_p2 }
  0x28   :  { %631 = shalt.err (!%p628_p4)
}
  0x29   :  { %s632_s28 = scalar_lea.vmem %s44_s19, 2048  ;;  %p637_p6 = scmp.lt.s32.totalorder %s44_s19, %s44_s19 }
  0x2a   :  { %p633_p5 = scmp.ne.s32.totalorder %s44_s19, %s632_s28  ;;  %p638_p7 = scmp.lt.s32.totalorder %s632_s28, %s632_s28 }
  0x2c   :  { %p639_p8 = por %p638_p7, %p637_p6 }
  0x2e   :  { %p640_p9 = pnand %p639_p8, %p633_p5 }
  0x30   :  { %643 = shalt.err (!%p640_p9)
}
  0x31   :  { %49 = dma.hbm_to_vmem [thread:$0]  %s780_s3, 2048, %s44_s19, [#allocation5], %s650_s30, %s650_s30, %s651_s6  }
  0x32   :  { %644 = dma.done.wait [#allocation3], 2048  }
  0x33   :  { %645 = vsyncadd [#allocation3], 4294965248 }
  0x34   :  { %646 = dma.done.wait [#allocation5], 4096  }
  0x35   :  { %647 = vsyncadd [#allocation5], 4294963200  ;;  %v653_v0 = vmov 0.0|0.0   ;;  %vm654_vm0 = vmmov 0   ;;  %v655_v1 = vmov 0.0   ;;  %v63_v2 = vld [vmem:[#allocation2] sm:$0xff] }
  0x36   :  { %498 = vmatprep.subr.bf16.mxu0 %v653_v0  ;;  %425 = vmatprep.mubr.msk.f32.mxu0 %vm654_vm0, %v655_v1  ;;  %v64_v3 = vld [vmem:[#allocation2 + $0x8] sm:$0xff]  ;;  %v65_v4 = vld [vmem:[#allocation2 + $0x10] sm:$0xff]  ;;  %v66_v6 = vld [vmem:[#allocation2 + $0x18] sm:$0xff] }
  0x37   :  { %522 = vmatprep.subr.bf16.mxu1 %v653_v0  ;;  %460 = vmatprep.mubr.msk.f32.mxu1 %vm654_vm0, %v655_v1  ;;  %v499_v5 = vpack.c.bf16 %v64_v3, %v63_v2  ;;  %v502_v7 = vpack.c.bf16 %v66_v6, %v65_v4  ;;  %v67_v8 = vld [vmem:[#allocation2 + $0x20] sm:$0xff]  ;;  %v68_v9 = vld [vmem:[#allocation2 + $0x28] sm:$0xff]  ;;  %v156_v12 = vld [vmem:[#allocation4 + $0x10] sm:$0xff] }
  0x38   :  { %v154_v10 = vld [vmem:[#allocation4] sm:$0xff]  ;;  %v155_v11 = vld [vmem:[#allocation4 + $0x8] sm:$0xff]  ;;  %v157_v13 = vld [vmem:[#allocation4 + $0x18] sm:$0xff]  ;;  %v505_v14 = vpack.c.bf16 %v68_v9, %v67_v8  ;;  %v79_v9 = vlaneseq }
  0x39   :  { %500 = vmatpush3.bf16.msra.mxu0 %v499_v5  ;;  %v523_v15 = vpack.c.bf16 %v155_v11, %v154_v10  ;;  %v69_v16 = vld [vmem:[#allocation2 + $0x30] sm:$0xff]  ;;  %v70_v17 = vld [vmem:[#allocation2 + $0x38] sm:$0xff]  ;;  %v526_v18 = vpack.c.bf16 %v157_v13, %v156_v12  ;;  %v158_v19 = vld [vmem:[#allocation4 + $0x20] sm:$0xff] }
  0x3a   :  { %501 = vmatprep.subr.bf16.mxu0 %v653_v0  ;;  %v159_v20 = vld [vmem:[#allocation4 + $0x28] sm:$0xff]  ;;  %v508_v21 = vpack.c.bf16 %v70_v17, %v69_v16  ;;  %v71_v22 = vld [vmem:[#allocation2 + $0x40] sm:$0xff]  ;;  %v160_v25 = vld [vmem:[#allocation4 + $0x30] sm:$0xff]  ;;  %v80_v10 = vshrl.u32 %v79_v9, 7 }
  0x3b   :  { %524 = vmatpush3.bf16.msra.mxu1 %v523_v15  ;;  %v72_v23 = vld [vmem:[#allocation2 + $0x48] sm:$0xff]  ;;  %v529_v24 = vpack.c.bf16 %v159_v20, %v158_v19  ;;  %v161_v26 = vld [vmem:[#allocation4 + $0x38] sm:$0xff]  ;;  %v73_v28 = vld [vmem:[#allocation2 + $0x50] sm:$0xff] }
  0x3c   :  { %525 = vmatprep.subr.bf16.mxu1 %v653_v0  ;;  %v511_v27 = vpack.c.bf16 %v72_v23, %v71_v22  ;;  %v74_v29 = vld [vmem:[#allocation2 + $0x58] sm:$0xff]  ;;  %v532_v30 = vpack.c.bf16 %v161_v26, %v160_v25  ;;  %v162_v31 = vld [vmem:[#allocation4 + $0x40] sm:$0xff]  ;;  %v163_v32 = vld [vmem:[#allocation4 + $0x48] sm:$0xff]  ;;  %v81_v11 = vsub.s32 0, %v80_v10  ;;  %v263_v26 = vsub.s32 2, %v80_v10 }
  0x3d   :  { %503 = vmatpush3.bf16.msra.mxu0 %v502_v7  ;;  %v514_v33 = vpack.c.bf16 %v74_v29, %v73_v28  ;;  %v75_v34 = vld [vmem:[#allocation2 + $0x60] sm:$0xff]  ;;  %v76_v35 = vld [vmem:[#allocation2 + $0x68] sm:$0xff]  ;;  %v535_v36 = vpack.c.bf16 %v163_v32, %v162_v31  ;;  %v164_v37 = vld [vmem:[#allocation4 + $0x50] sm:$0xff] }
  0x3e   :  { %504 = vmatprep.subr.bf16.mxu0 %v653_v0  ;;  %v165_v38 = vld [vmem:[#allocation4 + $0x58] sm:$0xff]  ;;  %v517_v39 = vpack.c.bf16 %v76_v35, %v75_v34  ;;  %v77_v40 = vld [vmem:[#allocation2 + $0x70] sm:$0xff]  ;;  %v166_v43 = vld [vmem:[#allocation4 + $0x60] sm:$0xff] }
  0x3f   :  { %527 = vmatpush3.bf16.msra.mxu1 %v526_v18  ;;  %v78_v41 = vld [vmem:[#allocation2 + $0x78] sm:$0xff]  ;;  %v538_v42 = vpack.c.bf16 %v165_v38, %v164_v37  ;;  %v167_v44 = vld [vmem:[#allocation4 + $0x68] sm:$0xff]  ;;  %v62_v47 = vld [vmem:[%s777_s0] sm:$0xff] }
  0x40   :  { %528 = vmatprep.subr.bf16.mxu1 %v653_v0  ;;  %v520_v45 = vpack.c.bf16 %v78_v41, %v77_v40  ;;  %v541_v46 = vpack.c.bf16 %v167_v44, %v166_v43  ;;  %v168_v48 = vld [vmem:[#allocation4 + $0x70] sm:$0xff]  ;;  %v169_v49 = vld [vmem:[#allocation4 + $0x78] sm:$0xff]  ;;  %v245_v51 = vld [vmem:[#allocation6] sm:$0xff] }
  0x41   :  { %506 = vmatpush3.bf16.msra.mxu0 %v505_v14  ;;  %v544_v50 = vpack.c.bf16 %v169_v49, %v168_v48  ;;  %v246_v52 = vld [vmem:[#allocation6 + $0x8] sm:$0xff]  ;;  %v247_v53 = vld [vmem:[#allocation6 + $0x10] sm:$0xff]  ;;  %v248_v55 = vld [vmem:[#allocation6 + $0x18] sm:$0xff] }
  0x42   :  { %507 = vmatprep.subr.bf16.mxu0 %v653_v0  ;;  %v547_v54 = vpack.c.bf16 %v246_v52, %v245_v51  ;;  %v550_v56 = vpack.c.bf16 %v248_v55, %v247_v53  ;;  %v249_v57 = vld [vmem:[#allocation6 + $0x20] sm:$0xff]  ;;  %v250_v58 = vld [vmem:[#allocation6 + $0x28] sm:$0xff]  ;;  %v251_v60 = vld [vmem:[#allocation6 + $0x30] sm:$0xff] }
  0x43   :  { %530 = vmatpush3.bf16.msra.mxu1 %v529_v24  ;;  %v553_v59 = vpack.c.bf16 %v250_v58, %v249_v57  ;;  %v252_v61 = vld [vmem:[#allocation6 + $0x38] sm:$0xff]  ;;  %v253_v63 = vld [vmem:[#allocation6 + $0x40] sm:$0xff]  ;;  %v255_v3 = vld [vmem:[#allocation6 + $0x50] sm:$0xff] }
  0x44   :  { %531 = vmatprep.subr.bf16.mxu1 %v653_v0  ;;  %v556_v62 = vpack.c.bf16 %v252_v61, %v251_v60  ;;  %v256_v4 = vld [vmem:[#allocation6 + $0x58] sm:$0xff]  ;;  %v257_v6 = vld [vmem:[#allocation6 + $0x60] sm:$0xff]  ;;  %v258_v7 = vld [vmem:[#allocation6 + $0x68] sm:$0xff] }
  0x45   :  { %509 = vmatpush3.bf16.msra.mxu0 %v508_v21  ;;  %v562_v5 = vpack.c.bf16 %v256_v4, %v255_v3  ;;  %v565_v8 = vpack.c.bf16 %v258_v7, %v257_v6  ;;  %v61_v12 = vld [vmem:[%s781_s4] sm:$0x7]  ;;  %v259_v18 = vld [vmem:[#allocation6 + $0x70] sm:$0xff]  ;;  %v260_v19 = vld [vmem:[#allocation6 + $0x78] sm:$0xff]  ;;  %v172_v21 = vsub.s32 1, %v80_v10 }
  0x46   :  { %510 = vmatprep.subr.bf16.mxu0 %v653_v0  ;;  %v82_v13 = vrot.slane %v61_v12, %v81_v11  ;;  %v568_v20 = vpack.c.bf16 %v260_v19, %v259_v18 }
  0x47   :  { %533 = vmatpush3.bf16.msra.mxu1 %v532_v30  ;;  %v173_v22 = vrot.slane %v61_v12, %v172_v21 }
  0x48   :  { %534 = vmatprep.subr.bf16.mxu1 %v653_v0 }
  0x49   :  { %512 = vmatpush3.bf16.msra.mxu0 %v511_v27  ;;  %v264_v27 = vrot.slane %v61_v12, %v263_v26 }
  0x4a   :  { %513 = vmatprep.subr.bf16.mxu0 %v653_v0 }
  0x4b   :  { %536 = vmatpush3.bf16.msra.mxu1 %v535_v36 }
  0x4c   :  { %537 = vmatprep.subr.bf16.mxu1 %v653_v0 }
  0x4d   :  { %515 = vmatpush3.bf16.msra.mxu0 %v514_v33 }
  0x4e   :  { %516 = vmatprep.subr.bf16.mxu0 %v653_v0 }
  0x4f   :  { %539 = vmatpush3.bf16.msra.mxu1 %v538_v42 }
  0x50   :  { %540 = vmatprep.subr.bf16.mxu1 %v653_v0 }
  0x51   :  { %518 = vmatpush3.bf16.msra.mxu0 %v517_v39 }
  0x52   :  { %519 = vmatprep.subr.bf16.mxu0 %v653_v0 }
  0x53   :  { %542 = vmatpush3.bf16.msra.mxu1 %v541_v46 }
  0x54   :  { %543 = vmatprep.subr.bf16.mxu1 %v653_v0 }
  0x55   :  { %521 = vmatpush3.bf16.msra.mxu0 %v520_v45 }
  0x56   :  { %546 = vmatprep.subr.bf16.mxu0 %v653_v0 }
  0x57   :  { %545 = vmatpush3.bf16.msra.mxu1 %v544_v50 }
  0x58   :  { %426 = vmatmul.mubr.f32.vlgmr.msra.gmra.mrb[0].mxu0 %v62_v47 }
  0x59   :  { %495 = vmatprep.mubr.msk.f32.mxu0 %vm654_vm0, %v655_v1  ;;  %548 = vmatpush3.bf16.msra.mxu0 %v547_v54  ;;  %v254_v1 = vld [vmem:[#allocation6 + $0x48] sm:$0xff] }
  0x5a   :  { %549 = vmatprep.subr.bf16.mxu0 %v653_v0  ;;  %v559_v2 = vpack.c.bf16 %v254_v1, %v253_v63 }
  0x5d   :  { %551 = vmatpush3.bf16.msra.mxu0 %v550_v56 }
  0x5e   :  { %552 = vmatprep.subr.bf16.mxu0 %v653_v0 }
  0x61   :  { %554 = vmatpush3.bf16.msra.mxu0 %v553_v59 }
  0x62   :  { %555 = vmatprep.subr.bf16.mxu0 %v653_v0 }
  0x65   :  { %557 = vmatpush3.bf16.msra.mxu0 %v556_v62 }
  0x66   :  { %558 = vmatprep.subr.bf16.mxu0 %v653_v0 }
  0x69   :  { %560 = vmatpush3.bf16.msra.mxu0 %v559_v2 }
  0x6a   :  { %561 = vmatprep.subr.bf16.mxu0 %v653_v0 }
  0x6d   :  { %563 = vmatpush3.bf16.msra.mxu0 %v562_v5 }
  0x6e   :  { %564 = vmatprep.subr.bf16.mxu0 %v653_v0 }
  0x71   :  { %566 = vmatpush3.bf16.msra.mxu0 %v565_v8 }
  0x72   :  { %567 = vmatprep.subr.bf16.mxu0 %v653_v0 }
  0x75   :  { %569 = vmatpush3.bf16.msra.mxu0 %v568_v20 }
 0x12b   :  { %v149_v14 = vpop.f32.mrb[0].mxu0 }
 0x12c   :  { %v150_v15 = vadd.f32 %v149_v14, %v82_v13  ;;  %v427_v16 = vpop.f32.mrb[1].mxu0 }
 0x12e   :  { %v153_v17 = vmax.f32 %v150_v15, 0.0 }
 0x130   :  { %461 = vmatmul.mubr.f32.vlgmr.msra.gmra.mrb[0].mxu1 %v153_v17 }
 0x203   :  { %v240_v0 = vpop.f32.mrb[0].mxu1 }
 0x204   :  { %v241_v23 = vadd.f32 %v240_v0, %v173_v22  ;;  %v462_v24 = vpop.f32.mrb[1].mxu1 }
 0x206   :  { %v244_v25 = vmax.f32 %v241_v23, 0.0 }
 0x208   :  { %496 = vmatmul.mubr.f32.vlgmr.msra.gmra.mrb[2].mxu0 %v244_v25 }
 0x2db   :  { %v331_v28 = vpop.f32.mrb[2].mxu0 }
 0x2dc   :  { %v332_v29 = vadd.f32 %v331_v28, %v264_v27  ;;  %v497_v30 = vpop.f32.mrb[3].mxu0 }
 0x2de   :  { %335 = vst [vmem:[%s782_s5] sm:$0xff] %v332_v29 }
 0x2df   :  { %340 = vsyncpa [#allocation3], 1 }
 0x2e0   :  { %341 = vsyncpa [#allocation5], 1 }

</bundles_post_ra>
